<compile_context>
chip_gen: v7x
topology: tpu7x:2x2x1
jax: 0.10.0
libtpu: 0.0.40
codegen_flags: <defaults>
</compile_context>

<pallas_src>
import numpy as np
import jax
import jax.numpy as jnp
from jax import lax
from jax.experimental import pallas as pl
from jax.experimental.pallas import tpu as pltpu

# ---- model hyper-parameters (mirrors Net(args): RKN(20, 1, hidden, kmer, ...)) ----
B, T = 16, 8            # batch, max sequence length (small demo shapes)
C = 20                  # amino-acid alphabet size (RKN input_size)
H = 32                  # args.hidden_size (number of anchor k-mers)
K = 3                   # args.kmer_size
SIGMA = 0.6             # args.sigma
ALPHA = 1.0 / (SIGMA * SIGMA)   # kappa(u) = exp(alpha * (u - 1))  (exp dot-product kernel)
LAM = 0.5               # gap-penalty factor lambda
# TODO(synk): exact gap-penalty parametrization / pooling variants of the rkn
# package are not reproducible without its source; lambda-weighted recursion +
# mean aggregation over valid positions is implemented here.
N_CLASS = 1             # RKN(20, 1, ...) -> one logit per sequence (proba=False branch)
PADN = 128              # lane-padded classifier width (lane-dense output stores)
KH_PAD = 128            # lane-padded K*H (adds one zero anchor block)
assert KH_PAD % H == 0 and KH_PAD >= K * H


def rkn_kernel(ids_ref, mask_ref, invlen_ref, wflat_ref, wproj_ref, bcls_ref, o_ref):
    """One grid point = one batch tile.  All operands resident in VMEM."""
    Tn, BT = ids_ref.shape
    Cc, KHP = wflat_ref.shape
    Hh = H

    # ---- vectorized pre-pass: one-hot in vregs -> ONE MXU matmul -> ONE exp ----
    ids = ids_ref[...]                                              # (T, BT) int32
    onehot = (lax.broadcasted_iota(jnp.int32, (Tn, BT, Cc), 2)
              == ids[:, :, None]).astype(jnp.bfloat16)              # exact in bf16
    # 2-D dot; the reshapes are sublane-tile aligned (BT % 8 == 0, lane dims
    # untouched) so no relayout copy is materialized.
    s_all = jnp.dot(onehot.reshape(Tn * BT, Cc), wflat_ref[...],
                    preferred_element_type=jnp.float32)             # (T*BT, KHP)
    s_all = s_all.reshape(Tn, BT, KHP)

    m_all = mask_ref[...]                                           # (T, BT, 1), exactly 0/1
    kh_valid = (lax.broadcasted_iota(jnp.int32, (1, 1, KHP), 2)
                < K * Hh).astype(jnp.float32)                       # zero the padded block
    bm_all = m_all * (kh_valid * jnp.exp(ALPHA * (s_all - 1.0)))    # mask folded into kappa
    lam_all = 1.0 - m_all * (1.0 - LAM)                             # LAM when valid, 1 when pad
    magg_all = m_all * invlen_ref[...][None]                        # mean-pool weights folded

    # ---- hoisted loop invariants (JAX does not CSE broadcast_in_dim) ----
    first_block = lax.broadcasted_iota(jnp.int32, (BT, KHP), 1) < Hh   # lanes of c^(0) block
    ones_full = jnp.ones((BT, KHP), jnp.float32)
    cs = jnp.zeros((BT, KHP), jnp.float32)     # stacked carry [c^(1) | ... | c^(K) | pad]
    agg = jnp.zeros((BT, KHP), jnp.float32)

    # ---- recurrence: one XLU roll + pure VPU fma per step; T is small & static
    # so it is fully unrolled and everything stays in vregs (no VMEM round-trip).
    # TODO(synk): for long sequences chunk the time axis as a trailing "arbitrary"
    # grid axis with (cs, agg) carried in VMEM scratch (and pl.Buffered(3) on the
    # streamed ids/mask) -- mandatory on v7x's 64 MiB VMEM.
    for t in range(Tn):
        prev = jnp.where(first_block, ones_full, pltpu.roll(cs, shift=Hh, axis=1))
        cs = lam_all[t] * cs + prev * bm_all[t]        # gap recursion (holds state when m=0)
        agg = agg + magg_all[t] * cs                   # full-width; slice once after loop

    feat = agg[:, (K - 1) * Hh:K * Hh]                 # top-level k-mer feature (BT, H)
    # Nystrom normalization folded into classifier: wproj = kinv @ wcls (lane-padded)
    o_ref[...] = (jnp.dot(feat, wproj_ref[...],
                          preferred_element_type=jnp.float32) + bcls_ref[...])


def rkn_forward_pallas(ids_tb, mask_tb1, invlen_b1, w_flat_pad, wproj_pad,
                       bcls_pad, b_tile=None, core_parallel=False):
    Tn, Bn = ids_tb.shape
    Cc, KHP = w_flat_pad.shape
    if b_tile is None:
        b_tile = Bn            # single grid step: per-step (~0.35us) overhead dominates
                               # tiny tiles on single-TC v5e/v6e chips
    assert Bn % b_tile == 0 and b_tile % 8 == 0
    assert b_tile == Bn or b_tile % 128 == 0   # keep the int32 ids block lane-legal
    grid = (Bn // b_tile,)
    # v7x: CORE_PARALLEL actually shards the batch axis across the 2 TensorCores
    # ("parallel" vs "arbitrary" is a measured no-op on single-TC chips).
    sem = (pltpu.CORE_PARALLEL,) if (core_parallel and grid[0] > 1) else ("arbitrary",)

    out = pl.pallas_call(
        rkn_kernel,
        out_shape=jax.ShapeDtypeStruct((Bn, PADN), jnp.float32),
        grid_spec=pltpu.PrefetchScalarGridSpec(
            num_scalar_prefetch=0,
            grid=grid,
            in_specs=[
                pl.BlockSpec((Tn, b_tile), lambda b: (0, b)),        # token ids (int32)
                pl.BlockSpec((Tn, b_tile, 1), lambda b: (0, b, 0)),  # exact 0/1 mask
                pl.BlockSpec((b_tile, 1), lambda b: (b, 0)),         # 1/length
                pl.BlockSpec((Cc, KHP), lambda b: (0, 0)),           # anchors, bf16, padded
                pl.BlockSpec((H, PADN), lambda b: (0, 0)),           # kinv@wcls, padded
                pl.BlockSpec((1, PADN), lambda b: (0, 0)),           # bias, padded
            ],
            out_specs=pl.BlockSpec((b_tile, PADN), lambda b: (b, 0)),
        ),
        compiler_params=pltpu.CompilerParams(dimension_semantics=sem),
    )(ids_tb, mask_tb1, invlen_b1, w_flat_pad, wproj_pad, bcls_pad)
    return out[:, :N_CLASS]


# ----------------------------- plain-JAX glue -----------------------------

def init_params(key):
    k1, k2 = jax.random.split(key, 2)
    w = jax.random.normal(k1, (H, K, C), jnp.float32)
    w = w / jnp.linalg.norm(w, axis=-1, keepdims=True)       # unit-norm anchors per position
    # quantize anchors once to bf16 (MXU input dtype); derived quantities use the same values
    w_bf16 = w.astype(jnp.bfloat16)
    w_f32 = w_bf16.astype(jnp.float32)

    # Nystrom normalization: kappa-Gram of anchors, inverse square root.
    gram_lin = jnp.einsum("ikc,jkc->ij", w_f32, w_f32)        # sum_k <z_ik, z_jk>
    gram = jnp.exp(ALPHA * (gram_lin - K))
    evals, evecs = jnp.linalg.eigh(gram)
    evals = jnp.clip(evals, 1e-6, None)
    kinv = (evecs * (evals ** -0.5)) @ evecs.T                # (H, H)

    wcls = 0.1 * jax.random.normal(k2, (H, N_CLASS), jnp.float32)
    bcls = jnp.zeros((1, N_CLASS), jnp.float32)

    # fold Nystrom normalization into the classifier and lane-pad to PADN
    wproj = kinv @ wcls                                       # (H, N_CLASS)
    wproj_pad = jnp.zeros((H, PADN), jnp.float32).at[:, :N_CLASS].set(wproj)
    bcls_pad = jnp.zeros((1, PADN), jnp.float32).at[:, :N_CLASS].set(bcls)

    # flatten anchors to (C, K*H), k-major column blocks, bf16, lane-pad to KH_PAD
    w_flat = jnp.transpose(w_bf16, (2, 1, 0)).reshape(C, K * H)
    w_flat_pad = jnp.zeros((C, KH_PAD), jnp.bfloat16).at[:, :K * H].set(w_flat)
    return w_flat, w_flat_pad, wproj_pad, bcls_pad, kinv, wcls, bcls


def prepare_inputs(tokens, lengths):
    """BioEmbedding(one_hot)-equivalent preprocessing, but shipping ids not one-hot."""
    ids_tb = jnp.transpose(tokens, (1, 0)).astype(jnp.int32)                  # (T, B)
    mask = (jnp.arange(T)[None, :] < lengths[:, None]).astype(jnp.float32)    # (B, T) exact 0/1
    mask_tb1 = jnp.transpose(mask, (1, 0))[..., None]                         # (T, B, 1)
    invlen_b1 = (1.0 / lengths.astype(jnp.float32))[:, None]                  # (B, 1)
    return ids_tb, mask_tb1, invlen_b1


def rkn_forward_ref(tokens, lengths, w_flat, kinv, wcls, bcls):
    """Pure-JAX reference of the same math (for verification)."""
    oh = jax.nn.one_hot(tokens, C, dtype=jnp.float32)                         # (B, T, C)
    mask = (jnp.arange(T)[None, :] < lengths[:, None]).astype(jnp.float32)    # (B, T)
    x_tbc = jnp.transpose(oh, (1, 0, 2))                                      # (T, B, C)
    mask_tb1 = jnp.transpose(mask, (1, 0))[..., None]                         # (T, B, 1)
    invlen = (1.0 / lengths.astype(jnp.float32))[:, None]                     # (B, 1)

    Tn, Bn, _ = x_tbc.shape
    w = w_flat.astype(jnp.float32)                                            # (C, K*H)
    cs = [jnp.zeros((Bn, H), jnp.float32) for _ in range(K)]
    agg = jnp.zeros((Bn, H), jnp.float32)
    for t in range(Tn):
        x_t, m_t = x_tbc[t], mask_tb1[t]
        prev = jnp.ones((Bn, H), jnp.float32)
        new_cs = []
        for k in range(K):
            s_k = x_t @ w[:, k * H:(k + 1) * H]
            b_k = jnp.exp(ALPHA * (s_k - 1.0))
            c_k = LAM * cs[k] + prev * b_k
            c_k = jnp.where(m_t > 0.0, c_k, cs[k])
            new_cs.append(c_k)
            prev = cs[k]
        cs = new_cs
        agg = agg + cs[-1] * m_t
    feat = (agg * invlen) @ kinv
    return feat @ wcls + bcls


if __name__ == "__main__":
    key = jax.random.PRNGKey(0)
    k_tok, k_len, k_par = jax.random.split(key, 3)

    tokens = jax.random.randint(k_tok, (B, T), 0, C, dtype=jnp.int32)    # amino-acid ids
    lengths = jax.random.randint(k_len, (B,), 3, T + 1, dtype=jnp.int32) # variable seq lengths

    w_flat, w_flat_pad, wproj_pad, bcls_pad, kinv, wcls, bcls = init_params(k_par)
    ids_tb, mask_tb1, invlen_b1 = prepare_inputs(tokens, lengths)

    out = rkn_forward_pallas(ids_tb, mask_tb1, invlen_b1, w_flat_pad, wproj_pad,
                             bcls_pad)                     # single grid step (1-TC default)
    out = jax.block_until_ready(out)

    ref = rkn_forward_ref(tokens, lengths, w_flat, kinv, wcls, bcls)
    np.testing.assert_allclose(np.asarray(out), np.asarray(ref), rtol=1e-2, atol=1e-2)

    print("KERNEL_OK")
</pallas_src>

<mosaic_0001>
module attributes {stable_mosaic.version = 11 : i64} {
  func.func @rkn_kernel(%arg0: i32, %arg1: memref<8x16xi32, #tpu.memory_space<vmem>>, %arg2: memref<8x16x1xf32, #tpu.memory_space<vmem>>, %arg3: memref<16x1xf32, #tpu.memory_space<vmem>>, %arg4: memref<20x128xbf16, #tpu.memory_space<vmem>>, %arg5: memref<32x128xf32, #tpu.memory_space<vmem>>, %arg6: memref<1x128xf32, #tpu.memory_space<vmem>>, %arg7: memref<16x128xf32, #tpu.memory_space<vmem>>) attributes {dimension_semantics = [#tpu.dimension_semantics<arbitrary>], iteration_bounds = array<i64: 1>, scalar_prefetch = 0 : i64, scratch_operands = 0 : i64, tpu.core_type = #tpu.core_type<tc>, window_params = [{transform_indices = @transform_0, window_bounds = array<i64: 8, 16>}, {transform_indices = @transform_1, window_bounds = array<i64: 8, 16, 1>}, {transform_indices = @transform_2, window_bounds = array<i64: 16, 1>}, {pipeline_mode = #tpu.pipeline_mode<synchronous>, transform_indices = @transform_3, window_bounds = array<i64: 20, 128>}, {pipeline_mode = #tpu.pipeline_mode<synchronous>, transform_indices = @transform_4, window_bounds = array<i64: 32, 128>}, {pipeline_mode = #tpu.pipeline_mode<synchronous>, transform_indices = @transform_5, window_bounds = array<i64: 1, 128>}, {transform_indices = @transform_6, window_bounds = array<i64: 16, 128>}]} {
    %c0 = arith.constant 0 : index
    %c0_0 = arith.constant 0 : index
    %0 = vector.load %arg1[%c0, %c0_0] : memref<8x16xi32, #tpu.memory_space<vmem>>, vector<8x16xi32>
    %1 = tpu.iota {dimensions = array<i32: 2>} : vector<8x16x20xi32>
    %2 = vector.shape_cast %0 : vector<8x16xi32> to vector<8x16x1xi32>
    %3 = vector.broadcast %2 : vector<8x16x1xi32> to vector<8x16x20xi32>
    %4 = arith.cmpi eq, %1, %3 : vector<8x16x20xi32>
    %5 = arith.extui %4 : vector<8x16x20xi1> to vector<8x16x20xi32>
    %6 = arith.sitofp %5 : vector<8x16x20xi32> to vector<8x16x20xf32>
    %7 = arith.truncf %6 : vector<8x16x20xf32> to vector<8x16x20xbf16>
    %8 = vector.shape_cast %7 : vector<8x16x20xbf16> to vector<128x20xbf16>
    %c0_1 = arith.constant 0 : index
    %c0_2 = arith.constant 0 : index
    %9 = vector.load %arg4[%c0_1, %c0_2] : memref<20x128xbf16, #tpu.memory_space<vmem>>, vector<20x128xbf16>
    %cst = arith.constant dense<0.000000e+00> : vector<128x128xf32>
    %10 = tpu.matmul %8, %9, %cst {dimension_numbers = #tpu.dot_dimension_numbers<[1], [0], [0], [1], [0, 0, 1, 1], [], []>} : vector<128x20xbf16>, vector<20x128xbf16>, vector<128x128xf32> -> vector<128x128xf32>
    %11 = vector.shape_cast %10 : vector<128x128xf32> to vector<8x16x128xf32>
    %c0_3 = arith.constant 0 : index
    %c0_4 = arith.constant 0 : index
    %c0_5 = arith.constant 0 : index
    %12 = vector.load %arg2[%c0_3, %c0_4, %c0_5] : memref<8x16x1xf32, #tpu.memory_space<vmem>>, vector<8x16x1xf32>
    %13 = tpu.iota {dimensions = array<i32: 2>} : vector<1x1x128xi32>
    %c96_i32 = arith.constant 96 : i32
    %14 = vector.broadcast %c96_i32 : i32 to vector<1x1x128xi32>
    %15 = arith.cmpi slt, %13, %14 : vector<1x1x128xi32>
    %16 = arith.extui %15 : vector<1x1x128xi1> to vector<1x1x128xi32>
    %17 = arith.sitofp %16 : vector<1x1x128xi32> to vector<1x1x128xf32>
    %cst_6 = arith.constant 1.000000e+00 : f32
    %18 = vector.broadcast %cst_6 : f32 to vector<8x16x128xf32>
    %19 = arith.subf %11, %18 : vector<8x16x128xf32>
    %cst_7 = arith.constant 2.77777767 : f32
    %20 = vector.broadcast %cst_7 : f32 to vector<8x16x128xf32>
    %21 = arith.mulf %20, %19 : vector<8x16x128xf32>
    %22 = math.exp %21 : vector<8x16x128xf32>
    %23 = vector.broadcast %17 : vector<1x1x128xf32> to vector<8x16x128xf32>
    %24 = arith.mulf %23, %22 : vector<8x16x128xf32>
    %25 = vector.broadcast %12 : vector<8x16x1xf32> to vector<8x16x128xf32>
    %26 = arith.mulf %25, %24 : vector<8x16x128xf32>
    %cst_8 = arith.constant 5.000000e-01 : f32
    %27 = vector.broadcast %cst_8 : f32 to vector<8x16x1xf32>
    %28 = arith.mulf %12, %27 : vector<8x16x1xf32>
    %cst_9 = arith.constant 1.000000e+00 : f32
    %29 = vector.broadcast %cst_9 : f32 to vector<8x16x1xf32>
    %30 = arith.subf %29, %28 : vector<8x16x1xf32>
    %c0_10 = arith.constant 0 : index
    %c0_11 = arith.constant 0 : index
    %31 = vector.load %arg3[%c0_10, %c0_11] : memref<16x1xf32, #tpu.memory_space<vmem>>, vector<16x1xf32>
    %32 = vector.shape_cast %31 : vector<16x1xf32> to vector<1x16x1xf32>
    %33 = vector.broadcast %32 : vector<1x16x1xf32> to vector<8x16x1xf32>
    %34 = arith.mulf %12, %33 : vector<8x16x1xf32>
    %35 = tpu.iota {dimensions = array<i32: 1>} : vector<16x128xi32>
    %c32_i32 = arith.constant 32 : i32
    %36 = vector.broadcast %c32_i32 : i32 to vector<16x128xi32>
    %37 = arith.cmpi slt, %35, %36 : vector<16x128xi32>
    %cst_12 = arith.constant 1.000000e+00 : f32
    %38 = vector.broadcast %cst_12 : f32 to vector<16x128xf32>
    %cst_13 = arith.constant 0.000000e+00 : f32
    %39 = vector.broadcast %cst_13 : f32 to vector<16x128xf32>
    %cst_14 = arith.constant 0.000000e+00 : f32
    %40 = vector.broadcast %cst_14 : f32 to vector<16x128xf32>
    %c32_i32_15 = arith.constant 32 : i32
    %41 = tpu.dynamic_rotate %39 by %c32_i32_15 dim 1 : vector<16x128xf32>, i32 -> vector<16x128xf32>
    %42 = arith.select %37, %38, %41 : vector<16x128xi1>, vector<16x128xf32>
    %43 = vector.extract_strided_slice %30 {offsets = [0, 0, 0], sizes = [1, 16, 1], strides = [1, 1, 1]} : vector<8x16x1xf32> to vector<1x16x1xf32>
    %44 = vector.shape_cast %43 : vector<1x16x1xf32> to vector<16x1xf32>
    %45 = vector.broadcast %44 : vector<16x1xf32> to vector<16x128xf32>
    %46 = arith.mulf %45, %39 : vector<16x128xf32>
    %47 = vector.extract_strided_slice %26 {offsets = [0, 0, 0], sizes = [1, 16, 128], strides = [1, 1, 1]} : vector<8x16x128xf32> to vector<1x16x128xf32>
    %48 = vector.shape_cast %47 : vector<1x16x128xf32> to vector<16x128xf32>
    %49 = arith.mulf %42, %48 : vector<16x128xf32>
    %50 = arith.addf %46, %49 : vector<16x128xf32>
    %51 = vector.extract_strided_slice %34 {offsets = [0, 0, 0], sizes = [1, 16, 1], strides = [1, 1, 1]} : vector<8x16x1xf32> to vector<1x16x1xf32>
    %52 = vector.shape_cast %51 : vector<1x16x1xf32> to vector<16x1xf32>
    %53 = vector.broadcast %52 : vector<16x1xf32> to vector<16x128xf32>
    %54 = arith.mulf %53, %50 : vector<16x128xf32>
    %55 = arith.addf %40, %54 : vector<16x128xf32>
    %c32_i32_16 = arith.constant 32 : i32
    %56 = tpu.dynamic_rotate %50 by %c32_i32_16 dim 1 : vector<16x128xf32>, i32 -> vector<16x128xf32>
    %57 = arith.select %37, %38, %56 : vector<16x128xi1>, vector<16x128xf32>
    %58 = vector.extract_strided_slice %30 {offsets = [1, 0, 0], sizes = [1, 16, 1], strides = [1, 1, 1]} : vector<8x16x1xf32> to vector<1x16x1xf32>
    %59 = vector.shape_cast %58 : vector<1x16x1xf32> to vector<16x1xf32>
    %60 = vector.broadcast %59 : vector<16x1xf32> to vector<16x128xf32>
    %61 = arith.mulf %60, %50 : vector<16x128xf32>
    %62 = vector.extract_strided_slice %26 {offsets = [1, 0, 0], sizes = [1, 16, 128], strides = [1, 1, 1]} : vector<8x16x128xf32> to vector<1x16x128xf32>
    %63 = vector.shape_cast %62 : vector<1x16x128xf32> to vector<16x128xf32>
    %64 = arith.mulf %57, %63 : vector<16x128xf32>
    %65 = arith.addf %61, %64 : vector<16x128xf32>
    %66 = vector.extract_strided_slice %34 {offsets = [1, 0, 0], sizes = [1, 16, 1], strides = [1, 1, 1]} : vector<8x16x1xf32> to vector<1x16x1xf32>
    %67 = vector.shape_cast %66 : vector<1x16x1xf32> to vector<16x1xf32>
    %68 = vector.broadcast %67 : vector<16x1xf32> to vector<16x128xf32>
    %69 = arith.mulf %68, %65 : vector<16x128xf32>
    %70 = arith.addf %55, %69 : vector<16x128xf32>
    %c32_i32_17 = arith.constant 32 : i32
    %71 = tpu.dynamic_rotate %65 by %c32_i32_17 dim 1 : vector<16x128xf32>, i32 -> vector<16x128xf32>
    %72 = arith.select %37, %38, %71 : vector<16x128xi1>, vector<16x128xf32>
    %73 = vector.extract_strided_slice %30 {offsets = [2, 0, 0], sizes = [1, 16, 1], strides = [1, 1, 1]} : vector<8x16x1xf32> to vector<1x16x1xf32>
    %74 = vector.shape_cast %73 : vector<1x16x1xf32> to vector<16x1xf32>
    %75 = vector.broadcast %74 : vector<16x1xf32> to vector<16x128xf32>
    %76 = arith.mulf %75, %65 : vector<16x128xf32>
    %77 = vector.extract_strided_slice %26 {offsets = [2, 0, 0], sizes = [1, 16, 128], strides = [1, 1, 1]} : vector<8x16x128xf32> to vector<1x16x128xf32>
    %78 = vector.shape_cast %77 : vector<1x16x128xf32> to vector<16x128xf32>
    %79 = arith.mulf %72, %78 : vector<16x128xf32>
    %80 = arith.addf %76, %79 : vector<16x128xf32>
    %81 = vector.extract_strided_slice %34 {offsets = [2, 0, 0], sizes = [1, 16, 1], strides = [1, 1, 1]} : vector<8x16x1xf32> to vector<1x16x1xf32>
    %82 = vector.shape_cast %81 : vector<1x16x1xf32> to vector<16x1xf32>
    %83 = vector.broadcast %82 : vector<16x1xf32> to vector<16x128xf32>
    %84 = arith.mulf %83, %80 : vector<16x128xf32>
    %85 = arith.addf %70, %84 : vector<16x128xf32>
    %c32_i32_18 = arith.constant 32 : i32
    %86 = tpu.dynamic_rotate %80 by %c32_i32_18 dim 1 : vector<16x128xf32>, i32 -> vector<16x128xf32>
    %87 = arith.select %37, %38, %86 : vector<16x128xi1>, vector<16x128xf32>
    %88 = vector.extract_strided_slice %30 {offsets = [3, 0, 0], sizes = [1, 16, 1], strides = [1, 1, 1]} : vector<8x16x1xf32> to vector<1x16x1xf32>
    %89 = vector.shape_cast %88 : vector<1x16x1xf32> to vector<16x1xf32>
    %90 = vector.broadcast %89 : vector<16x1xf32> to vector<16x128xf32>
    %91 = arith.mulf %90, %80 : vector<16x128xf32>
    %92 = vector.extract_strided_slice %26 {offsets = [3, 0, 0], sizes = [1, 16, 128], strides = [1, 1, 1]} : vector<8x16x128xf32> to vector<1x16x128xf32>
    %93 = vector.shape_cast %92 : vector<1x16x128xf32> to vector<16x128xf32>
    %94 = arith.mulf %87, %93 : vector<16x128xf32>
    %95 = arith.addf %91, %94 : vector<16x128xf32>
    %96 = vector.extract_strided_slice %34 {offsets = [3, 0, 0], sizes = [1, 16, 1], strides = [1, 1, 1]} : vector<8x16x1xf32> to vector<1x16x1xf32>
    %97 = vector.shape_cast %96 : vector<1x16x1xf32> to vector<16x1xf32>
    %98 = vector.broadcast %97 : vector<16x1xf32> to vector<16x128xf32>
    %99 = arith.mulf %98, %95 : vector<16x128xf32>
    %100 = arith.addf %85, %99 : vector<16x128xf32>
    %c32_i32_19 = arith.constant 32 : i32
    %101 = tpu.dynamic_rotate %95 by %c32_i32_19 dim 1 : vector<16x128xf32>, i32 -> vector<16x128xf32>
    %102 = arith.select %37, %38, %101 : vector<16x128xi1>, vector<16x128xf32>
    %103 = vector.extract_strided_slice %30 {offsets = [4, 0, 0], sizes = [1, 16, 1], strides = [1, 1, 1]} : vector<8x16x1xf32> to vector<1x16x1xf32>
    %104 = vector.shape_cast %103 : vector<1x16x1xf32> to vector<16x1xf32>
    %105 = vector.broadcast %104 : vector<16x1xf32> to vector<16x128xf32>
    %106 = arith.mulf %105, %95 : vector<16x128xf32>
    %107 = vector.extract_strided_slice %26 {offsets = [4, 0, 0], sizes = [1, 16, 128], strides = [1, 1, 1]} : vector<8x16x128xf32> to vector<1x16x128xf32>
    %108 = vector.shape_cast %107 : vector<1x16x128xf32> to vector<16x128xf32>
    %109 = arith.mulf %102, %108 : vector<16x128xf32>
    %110 = arith.addf %106, %109 : vector<16x128xf32>
    %111 = vector.extract_strided_slice %34 {offsets = [4, 0, 0], sizes = [1, 16, 1], strides = [1, 1, 1]} : vector<8x16x1xf32> to vector<1x16x1xf32>
    %112 = vector.shape_cast %111 : vector<1x16x1xf32> to vector<16x1xf32>
    %113 = vector.broadcast %112 : vector<16x1xf32> to vector<16x128xf32>
    %114 = arith.mulf %113, %110 : vector<16x128xf32>
    %115 = arith.addf %100, %114 : vector<16x128xf32>
    %c32_i32_20 = arith.constant 32 : i32
    %116 = tpu.dynamic_rotate %110 by %c32_i32_20 dim 1 : vector<16x128xf32>, i32 -> vector<16x128xf32>
    %117 = arith.select %37, %38, %116 : vector<16x128xi1>, vector<16x128xf32>
    %118 = vector.extract_strided_slice %30 {offsets = [5, 0, 0], sizes = [1, 16, 1], strides = [1, 1, 1]} : vector<8x16x1xf32> to vector<1x16x1xf32>
    %119 = vector.shape_cast %118 : vector<1x16x1xf32> to vector<16x1xf32>
    %120 = vector.broadcast %119 : vector<16x1xf32> to vector<16x128xf32>
    %121 = arith.mulf %120, %110 : vector<16x128xf32>
    %122 = vector.extract_strided_slice %26 {offsets = [5, 0, 0], sizes = [1, 16, 128], strides = [1, 1, 1]} : vector<8x16x128xf32> to vector<1x16x128xf32>
    %123 = vector.shape_cast %122 : vector<1x16x128xf32> to vector<16x128xf32>
    %124 = arith.mulf %117, %123 : vector<16x128xf32>
    %125 = arith.addf %121, %124 : vector<16x128xf32>
    %126 = vector.extract_strided_slice %34 {offsets = [5, 0, 0], sizes = [1, 16, 1], strides = [1, 1, 1]} : vector<8x16x1xf32> to vector<1x16x1xf32>
    %127 = vector.shape_cast %126 : vector<1x16x1xf32> to vector<16x1xf32>
    %128 = vector.broadcast %127 : vector<16x1xf32> to vector<16x128xf32>
    %129 = arith.mulf %128, %125 : vector<16x128xf32>
    %130 = arith.addf %115, %129 : vector<16x128xf32>
    %c32_i32_21 = arith.constant 32 : i32
    %131 = tpu.dynamic_rotate %125 by %c32_i32_21 dim 1 : vector<16x128xf32>, i32 -> vector<16x128xf32>
    %132 = arith.select %37, %38, %131 : vector<16x128xi1>, vector<16x128xf32>
    %133 = vector.extract_strided_slice %30 {offsets = [6, 0, 0], sizes = [1, 16, 1], strides = [1, 1, 1]} : vector<8x16x1xf32> to vector<1x16x1xf32>
    %134 = vector.shape_cast %133 : vector<1x16x1xf32> to vector<16x1xf32>
    %135 = vector.broadcast %134 : vector<16x1xf32> to vector<16x128xf32>
    %136 = arith.mulf %135, %125 : vector<16x128xf32>
    %137 = vector.extract_strided_slice %26 {offsets = [6, 0, 0], sizes = [1, 16, 128], strides = [1, 1, 1]} : vector<8x16x128xf32> to vector<1x16x128xf32>
    %138 = vector.shape_cast %137 : vector<1x16x128xf32> to vector<16x128xf32>
    %139 = arith.mulf %132, %138 : vector<16x128xf32>
    %140 = arith.addf %136, %139 : vector<16x128xf32>
    %141 = vector.extract_strided_slice %34 {offsets = [6, 0, 0], sizes = [1, 16, 1], strides = [1, 1, 1]} : vector<8x16x1xf32> to vector<1x16x1xf32>
    %142 = vector.shape_cast %141 : vector<1x16x1xf32> to vector<16x1xf32>
    %143 = vector.broadcast %142 : vector<16x1xf32> to vector<16x128xf32>
    %144 = arith.mulf %143, %140 : vector<16x128xf32>
    %145 = arith.addf %130, %144 : vector<16x128xf32>
    %c32_i32_22 = arith.constant 32 : i32
    %146 = tpu.dynamic_rotate %140 by %c32_i32_22 dim 1 : vector<16x128xf32>, i32 -> vector<16x128xf32>
    %147 = arith.select %37, %38, %146 : vector<16x128xi1>, vector<16x128xf32>
    %148 = vector.extract_strided_slice %30 {offsets = [7, 0, 0], sizes = [1, 16, 1], strides = [1, 1, 1]} : vector<8x16x1xf32> to vector<1x16x1xf32>
    %149 = vector.shape_cast %148 : vector<1x16x1xf32> to vector<16x1xf32>
    %150 = vector.broadcast %149 : vector<16x1xf32> to vector<16x128xf32>
    %151 = arith.mulf %150, %140 : vector<16x128xf32>
    %152 = vector.extract_strided_slice %26 {offsets = [7, 0, 0], sizes = [1, 16, 128], strides = [1, 1, 1]} : vector<8x16x128xf32> to vector<1x16x128xf32>
    %153 = vector.shape_cast %152 : vector<1x16x128xf32> to vector<16x128xf32>
    %154 = arith.mulf %147, %153 : vector<16x128xf32>
    %155 = arith.addf %151, %154 : vector<16x128xf32>
    %156 = vector.extract_strided_slice %34 {offsets = [7, 0, 0], sizes = [1, 16, 1], strides = [1, 1, 1]} : vector<8x16x1xf32> to vector<1x16x1xf32>
    %157 = vector.shape_cast %156 : vector<1x16x1xf32> to vector<16x1xf32>
    %158 = vector.broadcast %157 : vector<16x1xf32> to vector<16x128xf32>
    %159 = arith.mulf %158, %155 : vector<16x128xf32>
    %160 = arith.addf %145, %159 : vector<16x128xf32>
    %161 = vector.extract_strided_slice %160 {offsets = [0, 64], sizes = [16, 32], strides = [1, 1]} : vector<16x128xf32> to vector<16x32xf32>
    %c0_23 = arith.constant 0 : index
    %c0_24 = arith.constant 0 : index
    %162 = vector.load %arg5[%c0_23, %c0_24] : memref<32x128xf32, #tpu.memory_space<vmem>>, vector<32x128xf32>
    %cst_25 = arith.constant dense<0.000000e+00> : vector<16x128xf32>
    %163 = tpu.matmul %161, %162, %cst_25 {dimension_numbers = #tpu.dot_dimension_numbers<[1], [0], [0], [1], [0, 0, 1, 1], [], []>} : vector<16x32xf32>, vector<32x128xf32>, vector<16x128xf32> -> vector<16x128xf32>
    %c0_26 = arith.constant 0 : index
    %c0_27 = arith.constant 0 : index
    %164 = vector.load %arg6[%c0_26, %c0_27] : memref<1x128xf32, #tpu.memory_space<vmem>>, vector<1x128xf32>
    %165 = vector.broadcast %164 : vector<1x128xf32> to vector<16x128xf32>
    %166 = arith.addf %163, %165 : vector<16x128xf32>
    %c0_28 = arith.constant 0 : index
    %c0_29 = arith.constant 0 : index
    %167 = vector.load %arg7[%c0_28, %c0_29] : memref<16x128xf32, #tpu.memory_space<vmem>>, vector<16x128xf32>
    tpu.vector_store %arg7[%c0_28, %c0_29], %166 {strides = array<i32>} : memref<16x128xf32, #tpu.memory_space<vmem>>, vector<16x128xf32>,
    return
  }
  func.func @transform_0(%arg0: i32) -> (i32, i32) {
    %c0_i32 = arith.constant 0 : i32
    %c0_i32_0 = arith.constant 0 : i32
    return %c0_i32, %arg0 : i32, i32
  }
  func.func @transform_1(%arg0: i32) -> (i32, i32, i32) {
    %c0_i32 = arith.constant 0 : i32
    %c0_i32_0 = arith.constant 0 : i32
    %c0_i32_1 = arith.constant 0 : i32
    return %c0_i32, %arg0, %c0_i32_0 : i32, i32, i32
  }
  func.func @transform_2(%arg0: i32) -> (i32, i32) {
    %c0_i32 = arith.constant 0 : i32
    %c0_i32_0 = arith.constant 0 : i32
    return %arg0, %c0_i32 : i32, i32
  }
  func.func @transform_3(%arg0: i32) -> (i32, i32) {
    %c0_i32 = arith.constant 0 : i32
    %c0_i32_0 = arith.constant 0 : i32
    %c0_i32_1 = arith.constant 0 : i32
    return %c0_i32, %c0_i32_0 : i32, i32
  }
  func.func @transform_4(%arg0: i32) -> (i32, i32) {
    %c0_i32 = arith.constant 0 : i32
    %c0_i32_0 = arith.constant 0 : i32
    %c0_i32_1 = arith.constant 0 : i32
    return %c0_i32, %c0_i32_0 : i32, i32
  }
  func.func @transform_5(%arg0: i32) -> (i32, i32) {
    %c0_i32 = arith.constant 0 : i32
    %c0_i32_0 = arith.constant 0 : i32
    %c0_i32_1 = arith.constant 0 : i32
    return %c0_i32, %c0_i32_0 : i32, i32
  }
  func.func @transform_6(%arg0: i32) -> (i32, i32) {
    %c0_i32 = arith.constant 0 : i32
    %c0_i32_0 = arith.constant 0 : i32
    return %arg0, %c0_i32 : i32, i32
  }
}

</mosaic_0001>

<bundles_post_ra>
// kernel: tpu_custom_call.1
= control target key start
LH: loop header
LB: loop body
LE: loop exit
PB: predicated region body
PF: predicated region fallthrough
CT: control target
= control target key end

     0   :  { %v26_v0 = vlaneseq  ;;  %vm209_vm0 = vcmask 1041408   ;;  %s1569_s0 = inlined_call_operand.vmem [shape: s32[8,16], index: 0, kind: input, shape index: {}]   ;;  %s1570_s1 = inlined_call_operand.vmem [shape: f32[8,16,1], index: 1, kind: input, shape index: {}]   ;;  %s1571_s2 = inlined_call_operand.vmem [shape: f32[16,1], index: 2, kind: input, shape index: {}]   ;;  %s1572_s3 = inlined_call_operand.vmem [shape: bf16[20,128], index: 3, kind: input, shape index: {}]   ;;  %s1573_s4 = inlined_call_operand.vmem [shape: f32[32,128], index: 4, kind: input, shape index: {}]   ;;  %s1574_s5 = inlined_call_operand.vmem [shape: f32[1,128], index: 5, kind: input, shape index: {}]   ;;  %s1575_s6 = inlined_call_operand.hbm [shape: f32[16,128], index: 6, kind: output, shape index: {}]  }
   0x1   :  { %v1072_v1 = vld [vmem:[%s1572_s3] sm:$0xff]   ;;  %v1073_v2 = vld [vmem:[%s1572_s3 + $0x8] ss:$0 sps:$4 sm:$0x33]  }
   0x2   :  { %v1179_v3 = vshrl.u32 %v26_v0, 7 }
   0x3   :  { %11 = vsyncpa [#allocation3], 0  ;;  %v1184_v4 = vld [vmem:[%s1569_s0] sm:$0xff]  ;;  %1018 = vmatprep.subr.bf16.mxu0 %v1072_v1  ;;  %1057 = vmatprep.subr.bf16.mxu1 %v1072_v1  ;;  %v211_v9 = vsel %vm209_vm0, %v1073_v2, 0  ;;  %v1130_v10 = vmov 0   ;;  %v1202_v16 = vld [vmem:[%s1570_s1 + $0x8] sm:$0xff] }
   0x4   :  { %v41_v5 = vsub.s32 1, %v1179_v3  ;;  %v30_v6 = vsub.s32 0, %v1179_v3  ;;  %1019 = vmatpush3.bf16.msra.mxu0 %v1072_v1  ;;  %1059 = vmatpush3.bf16.msra.mxu1 %v1072_v1  ;;  %v52_v11 = vsub.s32 2, %v1179_v3  ;;  %v63_v13 = vsub.s32 3, %v1179_v3  ;;  %v1197_v15 = vld [vmem:[%s1570_s1] sm:$0xff]  ;;  %s1132_s29 = smov 32  }
   0x5   :  { %1061 = vmatprep.subr.msk.bf16.mxu0 %vm209_vm0, %v1073_v2  ;;  %1062 = vmatprep.subr.msk.bf16.mxu1 %vm209_vm0, %v1073_v2  ;;  %v506_v17 = vmul.f32 0.5, %v1202_v16  ;;  %v505_v18 = vmul.f32 0.5, %v1197_v15  ;;  %v74_v21 = vsub.s32 4, %v1179_v3  ;;  %v85_v23 = vsub.s32 5, %v1179_v3  ;;  %v1216_v25 = vld [vmem:[%s1570_s1 + $0x10] sm:$0xff]  ;;  %v1223_v28 = vld [vmem:[%s1570_s1 + $0x18] sm:$0xff] }
   0x6   :  { %v42_v7 = vrot.slane %v1184_v4, %v41_v5  ;;  %v31_v8 = vrot.slane %v1184_v4, %v30_v6  ;;  %1071 = vset.pattern.permute.xlu1 %v1130_v10  ;;  %1070 = vset.pattern.permute.xlu0 %v1130_v10  ;;  %v53_v12 = vrot.slane %v1184_v4, %v52_v11  ;;  %v1131_v24 = vmov 0.0   ;;  %s1134_s20 = smov [#allocation2]  }
   0x7   :  { %v64_v14 = vrot.slane %v1184_v4, %v63_v13  ;;  %v521_v19 = vsub.f32 1.0, %v505_v18  ;;  %v522_v20 = vsub.f32 1.0, %v506_v17  ;;  %v75_v22 = vrot.slane %v1184_v4, %v74_v21  ;;  %s945_s21 = sshll.u32 %s1134_s20, 4  ;;  %s946_s21 = int_to_ptr.vmem [resolvable:$true] %s945_s21 }
   0x8   :  { %44 = vbcast.lane.b32.xlu1 %v42_v7, 256  ;;  %33 = vbcast.lane.b32.xlu0 %v31_v8, 256  ;;  %v86_v26 = vrot.slane %v1184_v4, %v85_v23  ;;  %v507_v27 = vmul.f32 0.5, %v1216_v25  ;;  %v508_v29 = vmul.f32 0.5, %v1223_v28  ;;  %v1229_v32 = vand.u32 127, %v26_v0  ;;  %s1106_s22 = scalar_lea.vmem %s946_s21, 256  ;;  %p1111_p1 = scmp.lt.s32.totalorder %s946_s21, %s946_s21 }
   0x9   :  { %1021 = vmatpush3.bf16.msra.mxu0 %v211_v9  ;;  %1060 = vmatpush3.bf16.msra.mxu1 %v211_v9  ;;  %vm184_vm5 = vcmask 162816   ;;  %p1107_p0 = scmp.ne.s32.totalorder %s946_s21, %s1106_s22  ;;  %p1112_p2 = scmp.lt.s32.totalorder %s1106_s22, %s1106_s22 }
   0xa   :  { %v523_v30 = vsub.f32 1.0, %v507_v27  ;;  %v524_v31 = vsub.f32 1.0, %v508_v29  ;;  %vm326_vm14 = vcmp.lt.s32.totalorder %v1229_v32, 96  ;;  %vm555_vm15 = vcmp.lt.s32.totalorder %v1229_v32, 32 }
   0xb   :  { %p1113_p3 = por %p1112_p2, %p1111_p1 }
   0xc   :  { %48 = vbcast.lane.b32.xlu1 %v42_v7, 264  ;;  %37 = vbcast.lane.b32.xlu0 %v31_v8, 264 }
   0xd   :  { %p1114_p4 = pnand %p1113_p3, %p1107_p0 }
  0x10   :  { %59 = vbcast.lane.b32.xlu1 %v53_v12, 264  ;;  %55 = vbcast.lane.b32.xlu0 %v53_v12, 256 }
  0x14   :  { %70 = vbcast.lane.b32.xlu1 %v64_v14, 264  ;;  %66 = vbcast.lane.b32.xlu0 %v64_v14, 256 }
  0x18   :  { %416 = vperm.xlu1 %1071, %v1202_v16   ;;  %411 = vperm.xlu0 %1070, %v1197_v15  }
  0x1c   :  { %561 = vperm.xlu1 %1071, %v521_v19   ;;  %566 = vperm.xlu0 %1070, %v522_v20  }
  0x20   :  { %556 = vrot.lane.b32.xlu1 %v1131_v24, %s1132_s29  ;;  %77 = vbcast.lane.b32.xlu0 %v75_v22, 256 }
  0x24   :  { %81 = vbcast.lane.b32.xlu1 %v75_v22, 264  ;;  %88 = vbcast.lane.b32.xlu0 %v86_v26, 256  ;;  %v1271_v22 = vsel %vm326_vm14, 1.0, %v1131_v24 }
  0x28   :  { %92 = vbcast.lane.b32.xlu1 %v86_v26, 264  ;;  %421 = vperm.xlu0 %1070, %v1216_v25  }
  0x2c   :  { %426 = vperm.xlu1 %1071, %v1223_v28   ;;  %597 = vperm.xlu0 %1070, %v523_v30  }
  0x30   :  { %602 = vperm.xlu1 %1071, %v524_v31  }
  0x7a   :  { %v45_v33 = vpop.permute.xlu1 %44  ;;  %v34_v34 = vpop.permute.xlu0 %33 }
  0x7b   :  { %vm118_vm1 = vcmp.eq.s32.totalorder %v1229_v32, %v45_v33  ;;  %vm116_vm2 = vcmp.eq.s32.totalorder %v1229_v32, %v34_v34 }
  0x7c   :  { %v958_v37 = vsel %vm118_vm1, 1.0, %v1131_v24  ;;  %v956_v38 = vsel %vm116_vm2, 1.0, %v1131_v24 }
  0x7e   :  { %v49_v35 = vpop.permute.xlu1 %48  ;;  %v38_v36 = vpop.permute.xlu0 %37 }
  0x7f   :  { %vm119_vm3 = vcmp.eq.s32.totalorder %v1229_v32, %v49_v35  ;;  %vm117_vm4 = vcmp.eq.s32.totalorder %v1229_v32, %v38_v36  ;;  %v1281_v36 = vld [vmem:[%s1570_s1 + $0x20] sm:$0xff] }
  0x80   :  { %v959_v39 = vsel %vm119_vm3, 1.0, %v1131_v24  ;;  %v957_v40 = vsel %vm117_vm4, 1.0, %v1131_v24  ;;  %vm858_vm4 = vcmask 261120  }
  0x81   :  { %v165_v41 = vpack.c.bf16 %v959_v39, %v958_v37  ;;  %v164_v42 = vpack.c.bf16 %v957_v40, %v956_v38  ;;  %v1288_v40 = vld [vmem:[%s1570_s1 + $0x28] sm:$0xff] }
  0x82   :  { %v60_v43 = vpop.permute.xlu1 %59  ;;  %v56_v44 = vpop.permute.xlu0 %55 }
  0x83   :  { %1022 = vmatprep.mubr.msk.bf16.mxu0 %vm184_vm5, %v164_v42  ;;  %vm121_vm6 = vcmp.eq.s32.totalorder %v1229_v32, %v60_v43  ;;  %vm120_vm7 = vcmp.eq.s32.totalorder %v1229_v32, %v56_v44  ;;  %v509_v42 = vmul.f32 0.5, %v1281_v36  ;;  %v510_v43 = vmul.f32 0.5, %v1288_v40 }
  0x84   :  { %1023 = vmatmul.mubr.msk.bf16.vlgmr.msra.gmra.mrb[0].mxu0 %vm184_vm5, %v165_v41  ;;  %v961_v45 = vsel %vm121_vm6, 1.0, %v1131_v24  ;;  %v960_v46 = vsel %vm120_vm7, 1.0, %v1131_v24 }
  0x85   :  { %v166_v47 = vpack.c.bf16 %v961_v45, %v960_v46  ;;  %v525_v44 = vsub.f32 1.0, %v509_v42  ;;  %v526_v45 = vsub.f32 1.0, %v510_v43 }
  0x86   :  { %v71_v48 = vpop.permute.xlu1 %70  ;;  %v67_v49 = vpop.permute.xlu0 %66 }
  0x87   :  { %vm123_vm8 = vcmp.eq.s32.totalorder %v1229_v32, %v71_v48  ;;  %vm122_vm9 = vcmp.eq.s32.totalorder %v1229_v32, %v67_v49  ;;  %1026 = vmatprep.mubr.msk.bf16.mxu0 %vm184_vm5, %v166_v47 }
  0x88   :  { %v963_v50 = vsel %vm123_vm8, 1.0, %v1131_v24  ;;  %v962_v51 = vsel %vm122_vm9, 1.0, %v1131_v24 }
  0x89   :  { %v167_v52 = vpack.c.bf16 %v963_v50, %v962_v51 }
  0x8c   :  { %1027 = vmatmul.mubr.msk.bf16.gmra.mrb[4].mxu0 %vm184_vm5, %v167_v52 }
  0x97   :  { %v417_v53 = vpop.permute.xlu1 %416  ;;  %v412_v55 = vpop.permute.xlu0 %411 }
  0x9b   :  { %v562_v54 = vpop.permute.xlu1 %561  ;;  %v567_v57 = vpop.permute.xlu0 %566 }
  0x9c   :  { %v569_v33 = vmul.f32 0.0, %v562_v54  ;;  %v570_v38 = vmul.f32 0.0, %v567_v57 }
  0x9f   :  { %v557_v56 = vpop.permute.xlu1 %556  ;;  %v78_v59 = vpop.permute.xlu0 %77 }
  0xa0   :  { %vm124_vm12 = vcmp.eq.s32.totalorder %v1229_v32, %v78_v59  ;;  %v558_v29 = vsel %vm555_vm15, 1.0, %v557_v56 }
  0xa1   :  { %v964_v0 = vsel %vm124_vm12, 1.0, %v1131_v24 }
  0xa3   :  { %v82_v58 = vpop.permute.xlu1 %81  ;;  %v89_v62 = vpop.permute.xlu0 %88 }
  0xa4   :  { %vm125_vm10 = vcmp.eq.s32.totalorder %v1229_v32, %v82_v58  ;;  %vm126_vm13 = vcmp.eq.s32.totalorder %v1229_v32, %v89_v62 }
  0xa5   :  { %v965_v60 = vsel %vm125_vm10, 1.0, %v1131_v24  ;;  %v966_v1 = vsel %vm126_vm13, 1.0, %v1131_v24 }
  0xa6   :  { %v168_v2 = vpack.c.bf16 %v965_v60, %v964_v0 }
  0xa7   :  { %v93_v61 = vpop.permute.xlu1 %92  ;;  %v422_v52 = vpop.permute.xlu0 %421 }
  0xa8   :  { %vm127_vm11 = vcmp.eq.s32.totalorder %v1229_v32, %v93_v61  ;;  %1030 = vmatprep.mubr.msk.bf16.mxu0 %vm184_vm5, %v168_v2 }
  0xa9   :  { %v967_v63 = vsel %vm127_vm11, 1.0, %v1131_v24 }
  0xaa   :  { %v169_v5 = vpack.c.bf16 %v967_v63, %v966_v1 }
  0xab   :  { %v598_v57 = vpop.permute.xlu0 %597 }
  0xac   :  { %1031 = vmatmul.mubr.msk.bf16.gmra.mrb[8].mxu0 %vm184_vm5, %v169_v5  ;;  %v96_v5 = vsub.s32 6, %v1179_v3 }
 0x157   :  { %v1024_v6 = vpop.f32.mrb[0].mxu0 }
 0x158   :  { %v247_v7 = vpop.f32.mrb[1].mxu0  ;;  %v985_v46 = vadd.f32 -1.0, %v1024_v6 }
 0x159   :  { %v983_v8 = vadd.f32 -1.0, %v247_v7  ;;  %v1025_v9 = vpop.f32.mrb[2].mxu0 }
 0x15a   :  { %v250_v10 = vpop.f32.mrb[3].mxu0  ;;  %v986_v47 = vadd.f32 -1.0, %v1025_v9  ;;  %v347_v48 = vmul.f32 2.7777777, %v985_v46 }
 0x15b   :  { %v345_v11 = vmul.f32 2.7777777, %v983_v8  ;;  %v984_v12 = vadd.f32 -1.0, %v250_v10 }
 0x15c   :  { %v348_v49 = vmul.f32 2.7777777, %v986_v47  ;;  %v365_v50 = vmul.f32 1.442695, %v347_v48 }
 0x15d   :  { %v361_v13 = vmul.f32 1.442695, %v345_v11  ;;  %v346_v14 = vmul.f32 2.7777777, %v984_v12  ;;  %v97_v11 = vrot.slane %v1184_v4, %v96_v5  ;;  %v107_v12 = vsub.s32 7, %v1179_v3 }
 0x15e   :  { %v367_v51 = vmul.f32 1.442695, %v348_v49 }
 0x15f   :  { %1074 = vpow2.f32 %v361_v13  ;;  %v363_v17 = vmul.f32 1.442695, %v346_v14  ;;  %v1261_v18 = vpop.f32.mrb[4].mxu0  ;;  %v108_v13 = vrot.slane %v1184_v4, %v107_v12  ;;  %v1323_v14 = vld [vmem:[%s1570_s1 + $0x30] sm:$0xff] }
 0x160   :  { %v1263_v19 = vpop.f32.mrb[5].mxu0  ;;  %v511_v3 = vmul.f32 0.5, %v1323_v14 }
 0x161   :  { %1076 = vpow2.f32 %v363_v17  ;;  %v1265_v20 = vpop.f32.mrb[6].mxu0  ;;  %v1328_v17 = vld [vmem:[%s1570_s1 + $0x38] sm:$0xff] }
 0x162   :  { %v1267_v21 = vpop.f32.mrb[7].mxu0  ;;  %1078 = vpow2.f32 %v365_v50  ;;  %v527_v4 = vsub.f32 1.0, %v511_v3 }
 0x163   :  { %1080 = vpow2.f32 %v367_v51 }
 0x169   :  { %v1075_v23 = vpop.eup %1074 }
 0x16a   :  { %v393_v26 = vmul.f32 %v1075_v23, %v1271_v22  ;;  %v512_v23 = vmul.f32 0.5, %v1328_v17 }
 0x16b   :  { %v1077_v27 = vpop.eup %1076 }
 0x16c   :  { %v394_v30 = vmul.f32 %v1077_v27, %v1271_v22  ;;  %v489_v31 = vmul.f32 %v412_v55, %v393_v26  ;;  %v1079_v54 = vpop.eup %1078  ;;  %v528_v26 = vsub.f32 1.0, %v512_v23 }
 0x16d   :  { %v1081_v55 = vpop.eup %1080  ;;  %v395_v56 = vmul.f32 %v1079_v54, %v1271_v22 }
 0x16e   :  { %v490_v34 = vmul.f32 %v417_v53, %v394_v30  ;;  %v571_v35 = vmul.f32 %v558_v29, %v489_v31  ;;  %v427_v53 = vpop.permute.xlu1 %426  ;;  %v396_v58 = vmul.f32 %v1081_v55, %v1271_v22 }
 0x16f   :  { %v491_v60 = vmul.f32 %v422_v52, %v395_v56 }
 0x170   :  { %v572_v37 = vmul.f32 %v558_v29, %v490_v34  ;;  %v1283_v39 = vadd.f32 %v571_v35, %v569_v33  ;;  %v492_v63 = vmul.f32 %v427_v53, %v396_v58  ;;  %v987_v33 = vadd.f32 -1.0, %v1263_v19 }
 0x171   :  { %v988_v34 = vadd.f32 -1.0, %v1267_v21 }
 0x172   :  { %v1290_v41 = vadd.f32 %v572_v37, %v570_v38  ;;  %589 = vrot.lane.b32.xlu0 %v1283_v39, %s1132_s29  ;;  %v603_v59 = vpop.permute.xlu1 %602  ;;  %v605_v0 = vmul.f32 %v598_v57, %v1283_v39  ;;  %v349_v35 = vmul.f32 2.7777777, %v987_v33  ;;  %v1354_v57 = vld [vmem:[%s1570_s1 + $0x40] sm:$0xff]  ;;  %v990_v33 = vadd.f32 -1.0, %v1265_v20 }
 0x173   :  { %v350_v37 = vmul.f32 2.7777777, %v988_v34 }
 0x174   :  { %591 = vrot.lane.b32.xlu1 %v1290_v41, %s1132_s29  ;;  %v606_v7 = vmul.f32 %v603_v59, %v1290_v41  ;;  %v369_v38 = vmul.f32 1.442695, %v349_v35  ;;  %v352_v35 = vmul.f32 2.7777777, %v990_v33 }
 0x175   :  { %v371_v42 = vmul.f32 1.442695, %v350_v37 }
 0x176   :  { %431 = vperm.xlu0 %1070, %v1281_v36   ;;  %1082 = vpow2.f32 %v369_v38  ;;  %v375_v38 = vmul.f32 1.442695, %v352_v35 }
 0x177   :  { %1084 = vpow2.f32 %v371_v42 }
 0x178   :  { %436 = vperm.xlu1 %1071, %v1288_v40  }
 0x17a   :  { %633 = vperm.xlu0 %1070, %v525_v44  }
 0x17c   :  { %638 = vperm.xlu1 %1071, %v526_v45  }
 0x17f   :  { %v1334_v27 = vpop.f32.mrb[8].mxu0 }
 0x180   :  { %v1336_v29 = vpop.f32.mrb[9].mxu0  ;;  %v1083_v45 = vpop.eup %1082 }
 0x181   :  { %v1338_v30 = vpop.f32.mrb[10].mxu0  ;;  %v1085_v46 = vpop.eup %1084  ;;  %v397_v47 = vmul.f32 %v1083_v45, %v1271_v22 }
 0x182   :  { %v1340_v31 = vpop.f32.mrb[11].mxu0  ;;  %v398_v49 = vmul.f32 %v1085_v46, %v1271_v22 }
 0x1e4   :  { %v590_v61 = vpop.permute.xlu0 %589 }
 0x1e5   :  { %v593_v62 = vsel %vm555_vm15, 1.0, %v590_v61 }
 0x1e6   :  { %v607_v1 = vmul.f32 %v593_v62, %v491_v60  ;;  %v592_v2 = vpop.permute.xlu1 %591  ;;  %v1362_v62 = vld [vmem:[%s1570_s1 + $0x48] sm:$0xff] }
 0x1e7   :  { %v594_v6 = vsel %vm555_vm15, 1.0, %v592_v2  ;;  %v514_v5 = vmul.f32 0.5, %v1362_v62 }
 0x1e8   :  { %v1309_v8 = vadd.f32 %v607_v1, %v605_v0  ;;  %v608_v9 = vmul.f32 %v594_v6, %v492_v63  ;;  %v513_v0 = vmul.f32 0.5, %v1354_v57 }
 0x1e9   :  { %v530_v3 = vsub.f32 1.0, %v514_v5  ;;  %v991_v5 = vadd.f32 -1.0, %v1336_v29 }
 0x1ea   :  { %v1311_v10 = vadd.f32 %v608_v9, %v606_v7  ;;  %625 = vrot.lane.b32.xlu0 %v1309_v8, %s1132_s29 }
 0x1ec   :  { %627 = vrot.lane.b32.xlu1 %v1311_v10, %s1132_s29 }
 0x1ee   :  { %99 = vbcast.lane.b32.xlu0 %v97_v11, 256 }
 0x1f0   :  { %103 = vbcast.lane.b32.xlu1 %v97_v11, 264  ;;  %v529_v11 = vsub.f32 1.0, %v513_v0 }
 0x1f2   :  { %110 = vbcast.lane.b32.xlu0 %v108_v13, 256 }
 0x1f4   :  { %114 = vbcast.lane.b32.xlu1 %v108_v13, 264 }
 0x1f5   :  { %v432_v43 = vpop.permute.xlu0 %431 }
 0x1f6   :  { %441 = vperm.xlu0 %1070, %v1323_v14   ;;  %v493_v51 = vmul.f32 %v432_v43, %v397_v47 }
 0x1f7   :  { %v437_v44 = vpop.permute.xlu1 %436 }
 0x1f8   :  { %446 = vperm.xlu1 %1071, %v1328_v17   ;;  %v494_v52 = vmul.f32 %v437_v44, %v398_v49 }
 0x1f9   :  { %v634_v48 = vpop.permute.xlu0 %633 }
 0x1fa   :  { %669 = vperm.xlu0 %1070, %v527_v4   ;;  %v641_v53 = vmul.f32 %v634_v48, %v1309_v8 }
 0x1fb   :  { %v639_v50 = vpop.permute.xlu1 %638 }
 0x1fc   :  { %674 = vperm.xlu1 %1071, %v528_v26   ;;  %v642_v58 = vmul.f32 %v639_v50, %v1311_v10  ;;  %v989_v26 = vadd.f32 -1.0, %v1261_v18 }
 0x1fe   :  { %v351_v34 = vmul.f32 2.7777777, %v989_v26 }
 0x200   :  { %v373_v37 = vmul.f32 1.442695, %v351_v34 }
 0x202   :  { %1086 = vpow2.f32 %v373_v37 }
 0x203   :  { %1088 = vpow2.f32 %v375_v38 }
 0x20c   :  { %v1087_v44 = vpop.eup %1086 }
 0x20d   :  { %v399_v46 = vmul.f32 %v1087_v44, %v1271_v22 }
 0x25c   :  { %v626_v19 = vpop.permute.xlu0 %625 }
 0x25d   :  { %v629_v21 = vsel %vm555_vm15, 1.0, %v626_v19 }
 0x25e   :  { %v643_v54 = vmul.f32 %v629_v21, %v493_v51  ;;  %v628_v55 = vpop.permute.xlu1 %627 }
 0x25f   :  { %v630_v56 = vsel %vm555_vm15, 1.0, %v628_v55 }
 0x260   :  { %v1357_v59 = vadd.f32 %v643_v54, %v641_v53  ;;  %v644_v60 = vmul.f32 %v630_v56, %v494_v52  ;;  %v100_v61 = vpop.permute.xlu0 %99  ;;  %v1396_v53 = vld [vmem:[%s1570_s1 + $0x50] sm:$0xff] }
 0x261   :  { %vm128_vm0 = vcmp.eq.s32.totalorder %v1229_v32, %v100_v61  ;;  %v515_v61 = vmul.f32 0.5, %v1396_v53 }
 0x262   :  { %v1365_v63 = vadd.f32 %v644_v60, %v642_v58  ;;  %661 = vrot.lane.b32.xlu0 %v1357_v59, %s1132_s29  ;;  %v968_v1 = vsel %vm128_vm0, 1.0, %v1131_v24  ;;  %v104_v2 = vpop.permute.xlu1 %103  ;;  %v1404_v58 = vld [vmem:[%s1570_s1 + $0x58] sm:$0xff] }
 0x263   :  { %vm129_vm1 = vcmp.eq.s32.totalorder %v1229_v32, %v104_v2  ;;  %v516_v0 = vmul.f32 0.5, %v1404_v58 }
 0x264   :  { %663 = vrot.lane.b32.xlu1 %v1365_v63, %s1132_s29  ;;  %v969_v6 = vsel %vm129_vm1, 1.0, %v1131_v24  ;;  %v111_v7 = vpop.permute.xlu0 %110 }
 0x265   :  { %vm130_vm2 = vcmp.eq.s32.totalorder %v1229_v32, %v111_v7  ;;  %v170_v9 = vpack.c.bf16 %v969_v6, %v968_v1  ;;  %v531_v1 = vsub.f32 1.0, %v515_v61  ;;  %v532_v2 = vsub.f32 1.0, %v516_v0 }
 0x266   :  { %451 = vperm.xlu0 %1070, %v1354_v57   ;;  %v970_v12 = vsel %vm130_vm2, 1.0, %v1131_v24  ;;  %v115_v13 = vpop.permute.xlu1 %114  ;;  %v992_v6 = vadd.f32 -1.0, %v1340_v31  ;;  %v353_v7 = vmul.f32 2.7777777, %v991_v5  ;;  %v993_v61 = vadd.f32 -1.0, %v1334_v27 }
 0x267   :  { %vm131_vm3 = vcmp.eq.s32.totalorder %v1229_v32, %v115_v13  ;;  %1034 = vmatprep.mubr.msk.bf16.mxu1 %vm184_vm5, %v170_v9  ;;  %v994_v0 = vadd.f32 -1.0, %v1338_v30 }
 0x268   :  { %456 = vperm.xlu1 %1071, %v1362_v62   ;;  %v971_v23 = vsel %vm131_vm3, 1.0, %v1131_v24  ;;  %v1089_v24 = vpop.eup %1088  ;;  %v354_v9 = vmul.f32 2.7777777, %v992_v6 }
 0x269   :  { %v171_v4 = vpack.c.bf16 %v971_v23, %v970_v12  ;;  %v400_v49 = vmul.f32 %v1089_v24, %v1271_v22 }
 0x26a   :  { %705 = vperm.xlu0 %1070, %v529_v11   ;;  %v377_v11 = vmul.f32 1.442695, %v353_v7  ;;  %v379_v12 = vmul.f32 1.442695, %v354_v9 }
 0x26b   :  { %1035 = vmatmul.mubr.msk.bf16.vlgmr.msra.gmra.mrb[0].mxu1 %vm184_vm5, %v171_v4 }
 0x26c   :  { %710 = vperm.xlu1 %1071, %v530_v3   ;;  %1090 = vpow2.f32 %v377_v11 }
 0x26d   :  { %1092 = vpow2.f32 %v379_v12 }
 0x275   :  { %v442_v42 = vpop.permute.xlu0 %441 }
 0x276   :  { %v495_v48 = vmul.f32 %v442_v42, %v399_v46  ;;  %v1091_v34 = vpop.eup %1090 }
 0x277   :  { %v447_v43 = vpop.permute.xlu1 %446  ;;  %v1093_v35 = vpop.eup %1092  ;;  %v401_v31 = vmul.f32 %v1091_v34, %v1271_v22 }
 0x278   :  { %v496_v50 = vmul.f32 %v447_v43, %v400_v49  ;;  %v402_v42 = vmul.f32 %v1093_v35, %v1271_v22  ;;  %v1436_v49 = vld [vmem:[%s1570_s1 + $0x60] sm:$0xff] }
 0x279   :  { %v670_v45 = vpop.permute.xlu0 %669 }
 0x27a   :  { %v677_v51 = vmul.f32 %v670_v45, %v1357_v59 }
 0x27b   :  { %v675_v47 = vpop.permute.xlu1 %674 }
 0x27c   :  { %v678_v54 = vmul.f32 %v675_v47, %v1365_v63 }
 0x2d4   :  { %v662_v18 = vpop.permute.xlu0 %661 }
 0x2d5   :  { %v665_v20 = vsel %vm555_vm15, 1.0, %v662_v18 }
 0x2d6   :  { %v679_v19 = vmul.f32 %v665_v20, %v495_v48  ;;  %v664_v21 = vpop.permute.xlu1 %663 }
 0x2d7   :  { %v666_v52 = vsel %vm555_vm15, 1.0, %v664_v21  ;;  %v517_v21 = vmul.f32 0.5, %v1436_v49 }
 0x2d8   :  { %v1399_v55 = vadd.f32 %v679_v19, %v677_v51  ;;  %v680_v56 = vmul.f32 %v666_v52, %v496_v50  ;;  %v1444_v51 = vld [vmem:[%s1570_s1 + $0x68] sm:$0xff] }
 0x2d9   :  { %v518_v52 = vmul.f32 0.5, %v1444_v51 }
 0x2da   :  { %v1406_v60 = vadd.f32 %v680_v56, %v678_v54  ;;  %697 = vrot.lane.b32.xlu0 %v1399_v55, %s1132_s29  ;;  %v533_v54 = vsub.f32 1.0, %v517_v21 }
 0x2db   :  { %v534_v56 = vsub.f32 1.0, %v518_v52 }
 0x2dc   :  { %699 = vrot.lane.b32.xlu1 %v1406_v60, %s1132_s29 }
 0x2de   :  { %461 = vperm.xlu0 %1070, %v1396_v53  }
 0x2e0   :  { %466 = vperm.xlu1 %1071, %v1404_v58  }
 0x2e2   :  { %741 = vperm.xlu0 %1070, %v531_v1   ;;  %v355_v1 = vmul.f32 2.7777777, %v993_v61 }
 0x2e4   :  { %746 = vperm.xlu1 %1071, %v532_v2   ;;  %v356_v2 = vmul.f32 2.7777777, %v994_v0  ;;  %v381_v5 = vmul.f32 1.442695, %v355_v1 }
 0x2e5   :  { %v452_v26 = vpop.permute.xlu0 %451 }
 0x2e6   :  { %v497_v38 = vmul.f32 %v452_v26, %v401_v31  ;;  %v383_v6 = vmul.f32 1.442695, %v356_v2  ;;  %1094 = vpow2.f32 %v381_v5 }
 0x2e7   :  { %v457_v33 = vpop.permute.xlu1 %456 }
 0x2e8   :  { %v498_v45 = vmul.f32 %v457_v33, %v402_v42  ;;  %1096 = vpow2.f32 %v383_v6 }
 0x2e9   :  { %v706_v29 = vpop.permute.xlu0 %705 }
 0x2ea   :  { %v713_v24 = vmul.f32 %v706_v29, %v1399_v55 }
 0x2eb   :  { %v711_v37 = vpop.permute.xlu1 %710 }
 0x2ec   :  { %v714_v18 = vmul.f32 %v711_v37, %v1406_v60 }
 0x2f0   :  { %v1095_v11 = vpop.eup %1094 }
 0x2f1   :  { %v403_v33 = vmul.f32 %v1095_v11, %v1271_v22 }
 0x2f2   :  { %v1097_v26 = vpop.eup %1096 }
 0x2f3   :  { %v404_v35 = vmul.f32 %v1097_v26, %v1271_v22 }
 0x33e   :  { %v1418_v13 = vpop.f32.mrb[0].mxu1 }
 0x33f   :  { %v1420_v3 = vpop.f32.mrb[1].mxu1 }
 0x340   :  { %v1422_v23 = vpop.f32.mrb[2].mxu1 }
 0x341   :  { %v1424_v4 = vpop.f32.mrb[3].mxu1 }
 0x34c   :  { %v698_v43 = vpop.permute.xlu0 %697 }
 0x34d   :  { %v701_v44 = vsel %vm555_vm15, 1.0, %v698_v43 }
 0x34e   :  { %v715_v46 = vmul.f32 %v701_v44, %v497_v38  ;;  %v700_v47 = vpop.permute.xlu1 %699  ;;  %v537_v44 = vld [vmem:[%s1571_s2] sm:$0xff] }
 0x34f   :  { %v702_v48 = vsel %vm555_vm15, 1.0, %v700_v47  ;;  %v551_v2 = vmul.f32 %v537_v44, %v1436_v49 }
 0x350   :  { %v1439_v20 = vadd.f32 %v715_v46, %v713_v24  ;;  %v716_v50 = vmul.f32 %v702_v48, %v498_v45  ;;  %v539_v48 = vmul.f32 %v537_v44, %v1197_v15 }
 0x352   :  { %v1446_v19 = vadd.f32 %v716_v50, %v714_v18  ;;  %733 = vrot.lane.b32.xlu0 %v1439_v20, %s1132_s29  ;;  %v538_v18 = vld [vmem:[%s1571_s2 + $0x8] sm:$0xff]  ;;  %v541_v50 = vmul.f32 %v537_v44, %v1216_v25  ;;  %v547_v25 = vmul.f32 %v537_v44, %v1354_v57 }
 0x353   :  { %v540_v21 = vmul.f32 %v538_v18, %v1202_v16  ;;  %v542_v52 = vmul.f32 %v538_v18, %v1223_v28  ;;  %v544_v15 = vmul.f32 %v538_v18, %v1288_v40  ;;  %v546_v61 = vmul.f32 %v538_v18, %v1328_v17  ;;  %v324_v16 = vld [vmem:[%s1570_s1 + $0x70] sm:$0xff]  ;;  %v325_v28 = vld [vmem:[%s1570_s1 + $0x78] sm:$0xff] }
 0x354   :  { %735 = vrot.lane.b32.xlu1 %v1446_v19, %s1132_s29  ;;  %v548_v40 = vmul.f32 %v538_v18, %v1362_v62  ;;  %v520_v17 = vmul.f32 0.5, %v325_v28  ;;  %v550_v1 = vmul.f32 %v538_v18, %v1404_v58  ;;  %v552_v5 = vmul.f32 %v538_v18, %v1444_v51 }
 0x355   :  { %v553_v6 = vmul.f32 %v537_v44, %v324_v16  ;;  %v554_v62 = vmul.f32 %v538_v18, %v325_v28  ;;  %v842_v18 = vld [vmem:[%s1573_s4 + $0x8] sm:$0xff] }
 0x356   :  { %471 = vperm.xlu0 %1070, %v1436_v49   ;;  %v536_v57 = vsub.f32 1.0, %v520_v17 }
 0x358   :  { %476 = vperm.xlu1 %1071, %v1444_v51  }
 0x35a   :  { %777 = vperm.xlu0 %1070, %v533_v54   ;;  %v543_v54 = vmul.f32 %v537_v44, %v1281_v36  ;;  %v519_v36 = vmul.f32 0.5, %v324_v16 }
 0x35c   :  { %782 = vperm.xlu1 %1071, %v534_v56   ;;  %v545_v56 = vmul.f32 %v537_v44, %v1323_v14  ;;  %v549_v14 = vmul.f32 %v537_v44, %v1396_v53  ;;  %v535_v0 = vsub.f32 1.0, %v519_v36  ;;  %v995_v53 = vadd.f32 -1.0, %v1420_v3 }
 0x35d   :  { %v462_v7 = vpop.permute.xlu0 %461 }
 0x35e   :  { %v499_v29 = vmul.f32 %v462_v7, %v403_v33  ;;  %v996_v7 = vadd.f32 -1.0, %v1424_v4 }
 0x35f   :  { %v467_v9 = vpop.permute.xlu1 %466 }
 0x360   :  { %v500_v31 = vmul.f32 %v467_v9, %v404_v35  ;;  %v357_v9 = vmul.f32 2.7777777, %v995_v53  ;;  %v358_v58 = vmul.f32 2.7777777, %v996_v7 }
 0x361   :  { %v742_v12 = vpop.permute.xlu0 %741 }
 0x362   :  { %v749_v37 = vmul.f32 %v742_v12, %v1439_v20  ;;  %v385_v11 = vmul.f32 1.442695, %v357_v9  ;;  %v387_v12 = vmul.f32 1.442695, %v358_v58 }
 0x363   :  { %v747_v34 = vpop.permute.xlu1 %746 }
 0x364   :  { %v750_v45 = vmul.f32 %v747_v34, %v1446_v19  ;;  %1098 = vpow2.f32 %v385_v11 }
 0x365   :  { %1100 = vpow2.f32 %v387_v12 }
 0x36e   :  { %v1099_v33 = vpop.eup %1098 }
 0x36f   :  { %v1101_v34 = vpop.eup %1100 }
 0x3c4   :  { %v734_v27 = vpop.permute.xlu0 %733 }
 0x3c5   :  { %v737_v30 = vsel %vm555_vm15, 1.0, %v734_v27 }
 0x3c6   :  { %v751_v38 = vmul.f32 %v737_v30, %v499_v29  ;;  %v736_v42 = vpop.permute.xlu1 %735  ;;  %v405_v29 = vmul.f32 %v1099_v33, %v1271_v22  ;;  %v406_v30 = vmul.f32 %v1101_v34, %v1271_v22 }
 0x3c7   :  { %v738_v43 = vsel %vm555_vm15, 1.0, %v736_v42 }
 0x3c8   :  { %v1469_v24 = vadd.f32 %v751_v38, %v749_v37  ;;  %v752_v46 = vmul.f32 %v738_v43, %v500_v31 }
 0x3ca   :  { %v1471_v47 = vadd.f32 %v752_v46, %v750_v45  ;;  %769 = vrot.lane.b32.xlu0 %v1469_v24, %s1132_s29 }
 0x3cc   :  { %771 = vrot.lane.b32.xlu1 %v1471_v47, %s1132_s29 }
 0x3ce   :  { %577 = vperm.xlu0 %1070, %v539_v48   ;;  %v841_v48 = vld [vmem:[%s1573_s4] sm:$0xff] }
 0x3d0   :  { %613 = vperm.xlu1 %1071, %v541_v50   ;;  %v843_v50 = vld [vmem:[%s1573_s4 + $0x10] sm:$0xff] }
 0x3d2   :  { %582 = vperm.xlu0 %1070, %v540_v21   ;;  %v1049_v21 = vpack.c.bf16 %v842_v18, %v841_v48 }
 0x3d4   :  { %618 = vperm.xlu1 %1071, %v542_v52   ;;  %v844_v52 = vld [vmem:[%s1573_s4 + $0x18] sm:$0xff]  ;;  %1050 = vmatprep.subr.bf16.mxu1 %v1049_v21  ;;  %s1133_s4 = smov 64  }
 0x3d5   :  { %v472_v49 = vpop.permute.xlu0 %471  ;;  %1052 = vmatpush3.bf16.msra.mxu1 %v1049_v21 }
 0x3d6   :  { %649 = vperm.xlu0 %1070, %v543_v54   ;;  %v501_v27 = vmul.f32 %v472_v49, %v405_v29 }
 0x3d7   :  { %v477_v26 = vpop.permute.xlu1 %476 }
 0x3d8   :  { %654 = vperm.xlu1 %1071, %v544_v15   ;;  %v502_v31 = vmul.f32 %v477_v26, %v406_v30  ;;  %v1053_v15 = vpack.c.bf16 %v844_v52, %v843_v50 }
 0x3d9   :  { %v778_v51 = vpop.permute.xlu0 %777 }
 0x3da   :  { %685 = vperm.xlu0 %1070, %v545_v56   ;;  %v785_v37 = vmul.f32 %v778_v51, %v1469_v24  ;;  %1054 = vmatprep.subr.bf16.mxu1 %v1053_v15 }
 0x3db   :  { %v783_v35 = vpop.permute.xlu1 %782  ;;  %1056 = vmatpush3.bf16.msra.mxu1 %v1053_v15 }
 0x3dc   :  { %690 = vperm.xlu1 %1071, %v546_v61   ;;  %v786_v44 = vmul.f32 %v783_v35, %v1471_v47 }
 0x3de   :  { %481 = vperm.xlu0 %1070, %v324_v16  }
 0x3e0   :  { %721 = vperm.xlu1 %1071, %v547_v25  }
 0x3e2   :  { %486 = vperm.xlu0 %1070, %v325_v28  }
 0x3e4   :  { %726 = vperm.xlu1 %1071, %v548_v40  }
 0x3e6   :  { %757 = vperm.xlu0 %1070, %v549_v14  }
 0x3e8   :  { %813 = vperm.xlu1 %1071, %v535_v0  }
 0x3ea   :  { %762 = vperm.xlu0 %1070, %v550_v1   ;;  %v997_v1 = vadd.f32 -1.0, %v1418_v13 }
 0x3ec   :  { %818 = vperm.xlu1 %1071, %v536_v57  }
 0x3ee   :  { %793 = vperm.xlu0 %1070, %v551_v2   ;;  %v998_v2 = vadd.f32 -1.0, %v1422_v23 }
 0x3f0   :  { %798 = vperm.xlu1 %1071, %v552_v5  }
 0x3f2   :  { %829 = vperm.xlu0 %1070, %v553_v6   ;;  %v359_v6 = vmul.f32 2.7777777, %v997_v1 }
 0x3f4   :  { %834 = vperm.xlu1 %1071, %v554_v62   ;;  %v360_v62 = vmul.f32 2.7777777, %v998_v2  ;;  %v389_v7 = vmul.f32 1.442695, %v359_v6 }
 0x3f6   :  { %v391_v58 = vmul.f32 1.442695, %v360_v62  ;;  %1102 = vpow2.f32 %v389_v7 }
 0x3f8   :  { %1104 = vpow2.f32 %v391_v58 }
 0x400   :  { %v1103_v34 = vpop.eup %1102 }
 0x402   :  { %v1105_v29 = vpop.eup %1104 }
 0x43c   :  { %v770_v3 = vpop.permute.xlu0 %769 }
 0x43d   :  { %v773_v4 = vsel %vm555_vm15, 1.0, %v770_v3 }
 0x43e   :  { %v787_v38 = vmul.f32 %v773_v4, %v501_v27  ;;  %v772_v42 = vpop.permute.xlu1 %771 }
 0x43f   :  { %v774_v43 = vsel %vm555_vm15, 1.0, %v772_v42 }
 0x440   :  { %v1510_v45 = vadd.f32 %v787_v38, %v785_v37  ;;  %v788_v46 = vmul.f32 %v774_v43, %v502_v31 }
 0x442   :  { %v1524_v54 = vadd.f32 %v788_v46, %v786_v44  ;;  %805 = vrot.lane.b32.xlu0 %v1510_v45, %s1132_s29 }
 0x444   :  { %807 = vrot.lane.b32.xlu1 %v1524_v54, %s1132_s29 }
 0x44d   :  { %v578_v56 = vpop.permute.xlu0 %577 }
 0x44e   :  { %v585_v13 = vmul.f32 %v578_v56, %v1283_v39 }
 0x44f   :  { %v614_v61 = vpop.permute.xlu1 %613 }
 0x450   :  { %v621_v26 = vmul.f32 %v614_v61, %v1309_v8 }
 0x451   :  { %v583_v16 = vpop.permute.xlu0 %582 }
 0x452   :  { %v623_v35 = vadd.f32 %v621_v26, %v585_v13  ;;  %v586_v27 = vmul.f32 %v583_v16, %v1290_v41 }
 0x453   :  { %v619_v25 = vpop.permute.xlu1 %618 }
 0x454   :  { %v622_v51 = vmul.f32 %v619_v25, %v1311_v10  ;;  %v407_v10 = vmul.f32 %v1103_v34, %v1271_v22 }
 0x455   :  { %v650_v28 = vpop.permute.xlu0 %649 }
 0x456   :  { %v657_v23 = vmul.f32 %v650_v28, %v1357_v59  ;;  %v624_v31 = vadd.f32 %v622_v51, %v586_v27  ;;  %v408_v59 = vmul.f32 %v1105_v29, %v1271_v22 }
 0x457   :  { %v655_v36 = vpop.permute.xlu1 %654 }
 0x458   :  { %v658_v30 = vmul.f32 %v655_v36, %v1365_v63  ;;  %v659_v37 = vadd.f32 %v657_v23, %v623_v35 }
 0x459   :  { %v686_v40 = vpop.permute.xlu0 %685 }
 0x45a   :  { %v693_v3 = vmul.f32 %v686_v40, %v1399_v55  ;;  %v660_v42 = vadd.f32 %v658_v30, %v624_v31 }
 0x45b   :  { %v691_v14 = vpop.permute.xlu1 %690 }
 0x45c   :  { %v694_v8 = vmul.f32 %v691_v14, %v1406_v60  ;;  %v695_v43 = vadd.f32 %v693_v3, %v659_v37 }
 0x45d   :  { %v482_v17 = vpop.permute.xlu0 %481 }
 0x45e   :  { %v503_v44 = vmul.f32 %v482_v17, %v407_v10  ;;  %v696_v46 = vadd.f32 %v694_v8, %v660_v42 }
 0x45f   :  { %v722_v0 = vpop.permute.xlu1 %721 }
 0x460   :  { %v729_v39 = vmul.f32 %v722_v0, %v1439_v20 }
 0x461   :  { %v487_v57 = vpop.permute.xlu0 %486 }
 0x462   :  { %v731_v48 = vadd.f32 %v729_v39, %v695_v43  ;;  %v504_v18 = vmul.f32 %v487_v57, %v408_v59 }
 0x463   :  { %v727_v5 = vpop.permute.xlu1 %726 }
 0x464   :  { %v730_v41 = vmul.f32 %v727_v5, %v1446_v19 }
 0x465   :  { %v758_v53 = vpop.permute.xlu0 %757 }
 0x466   :  { %v765_v63 = vmul.f32 %v758_v53, %v1469_v24  ;;  %v732_v15 = vadd.f32 %v730_v41, %v696_v46 }
 0x467   :  { %v814_v9 = vpop.permute.xlu1 %813 }
 0x468   :  { %v821_v20 = vmul.f32 %v814_v9, %v1510_v45  ;;  %v767_v19 = vadd.f32 %v765_v63, %v731_v48 }
 0x469   :  { %v763_v11 = vpop.permute.xlu0 %762 }
 0x46a   :  { %v766_v50 = vmul.f32 %v763_v11, %v1471_v47 }
 0x46b   :  { %v819_v12 = vpop.permute.xlu1 %818 }
 0x46c   :  { %v822_v56 = vmul.f32 %v819_v12, %v1524_v54  ;;  %v768_v28 = vadd.f32 %v766_v50, %v732_v15 }
 0x46d   :  { %v794_v49 = vpop.permute.xlu0 %793 }
 0x46e   :  { %v801_v22 = vmul.f32 %v794_v49, %v1510_v45 }
 0x46f   :  { %v799_v33 = vpop.permute.xlu1 %798 }
 0x470   :  { %v802_v61 = vmul.f32 %v799_v33, %v1524_v54  ;;  %v803_v36 = vadd.f32 %v801_v22, %v767_v19  ;;  %v999_v54 = vld [vmem:[%s1574_s5] ss:$0 sm:$0xff] }
 0x471   :  { %v830_v4 = vpop.permute.xlu0 %829 }
 0x472   :  { %v804_v47 = vadd.f32 %v802_v61, %v768_v28 }
 0x473   :  { %v835_v38 = vpop.permute.xlu1 %834 }
 0x4b4   :  { %v806_v55 = vpop.permute.xlu0 %805 }
 0x4b5   :  { %v809_v60 = vsel %vm555_vm15, 1.0, %v806_v55 }
 0x4b6   :  { %v823_v21 = vmul.f32 %v809_v60, %v503_v44  ;;  %v808_v52 = vpop.permute.xlu1 %807 }
 0x4b7   :  { %v810_v24 = vsel %vm555_vm15, 1.0, %v808_v52 }
 0x4b8   :  { %v825_v16 = vadd.f32 %v823_v21, %v821_v20  ;;  %v824_v25 = vmul.f32 %v810_v24, %v504_v18 }
 0x4ba   :  { %v837_v40 = vmul.f32 %v830_v4, %v825_v16  ;;  %v826_v14 = vadd.f32 %v824_v25, %v822_v56 }
 0x4bc   :  { %v838_v17 = vmul.f32 %v835_v38, %v826_v14  ;;  %v839_v45 = vadd.f32 %v837_v40, %v803_v36 }
 0x4be   :  { %854 = vrot.lane.b32.xlu0 %v839_v45, %s1133_s4  ;;  %v840_v0 = vadd.f32 %v838_v17, %v804_v47 }
 0x4c0   :  { %856 = vrot.lane.b32.xlu1 %v840_v0, %s1133_s4 }
 0x530   :  { %v855_v32 = vpop.permute.xlu0 %854 }
 0x531   :  { %1046 = vmatprep.mubr.msk.f32.mxu1 %vm858_vm4, %v855_v32 }
 0x532   :  { %v857_v1 = vpop.permute.xlu1 %856 }
 0x533   :  { %1047 = vmatmul.mubr.msk.f32.vlgmr.msra.gmra.mrb[4].mxu1 %vm858_vm4, %v857_v1 }
 0x606   :  { %v1048_v57 = vpop.f32.mrb[4].mxu1 }
 0x607   :  { %v935_v2 = vadd.f32 %v1048_v57, %v999_v54  ;;  %v929_v5 = vpop.f32.mrb[5].mxu1 }
 0x608   :  { %v930_v6 = vadd.f32 %v999_v54, %v929_v5 }
 0x609   :  { %939 = vst [vmem:[#allocation2 + $0x8] sm:$0xff] %v935_v2 }
 0x60a   :  { %938 = vst [vmem:[#allocation2] sm:$0xff] %v930_v6 }
 0x60b   :  { %1117 = shalt.err (!%p1114_p4)
}
 0x60c   :  { %s1118_s5 = scalar_lea.hbm %s1575_s6, 256 }
 0x60d   :  { %p1119_p5 = scmp.ne.s32.totalorder %s1575_s6, %s1118_s5  ;;  %p1122_p6 = scmp.lt.u32.totalorder %s1118_s5, %s1575_s6 }
 0x60f   :  { %p1124_p7 = pnand %p1122_p6, %p1119_p5 }
 0x611   :  { %1127 = shalt.err (!%p1124_p7)
}
 0x612   :  { %s1135_s27 = smov 128   ;;  %s1136_s28 = smov 8  }
 0x613   :  { %951 = dma.vmem_to_hbm [thread:$0]  %s946_s21, 256, %s1575_s6, [#allocation3], %s1135_s27, %s1135_s27, %s1136_s28  }
 0x614   :  { %1128 = dma.done.wait [#allocation3], 256  }
 0x615   :  { %1129 = vsyncadd [#allocation3], 4294967040 }
 0x616   :  { %955 = vsyncpa [#allocation3], 1 }

</bundles_post_ra>
